<compile_context>
chip_gen: v6e
topology: v6e:2x2x1
jax: 0.10.0
libtpu: 0.0.40
codegen_flags: <defaults>
</compile_context>

<pallas_src>
import jax
import jax.numpy as jnp
from jax.experimental import pallas as pl
from jax.experimental.pallas import tpu as pltpu

EPS = 1e-5


# ------------------------------ Pallas kernels --------------------------------
def _conv3_bf16(rows_f32, w0, w1, w2, n_out):
    """3-tap conv along rows: out[r] = rows[r]@w0 + rows[r+1]@w1 + rows[r+2]@w2 (f32 accum)."""
    a0 = rows_f32[0:n_out].astype(jnp.bfloat16)
    a1 = rows_f32[1:n_out + 1].astype(jnp.bfloat16)
    a2 = rows_f32[2:n_out + 2].astype(jnp.bfloat16)
    y = jnp.dot(a0, w0, preferred_element_type=jnp.float32)
    y = y + jnp.dot(a1, w1, preferred_element_type=jnp.float32)
    y = y + jnp.dot(a2, w2, preferred_element_type=jnp.float32)
    return y


def _tile_stats(y, n_rows):
    """Per-tile sum and centered sum-of-squares (combined Chan-style in the wrapper)."""
    s = jnp.sum(y, axis=0, keepdims=True)                 # (1, C)
    m = s * (1.0 / n_rows)
    q = jnp.sum((y - m) ** 2, axis=0, keepdims=True)      # (1, C)
    return s, q


def conv1_stats_kernel(x_ref, w_ref, y_ref, s_ref, q_ref):
    # x_ref: (1, 1, TL+4, C) input tile with a 2-row halo (zero padded at sequence edges).
    # y_ref: (1, 1, TL+2, C) conv1 output with a 1-row halo (consumed by pass B without re-gather).
    tl = x_ref.shape[2] - 4
    xt = x_ref[0, 0]                                        # (TL+4, C) f32
    y = _conv3_bf16(xt, w_ref[0], w_ref[1], w_ref[2], tl + 2)
    y_ref[0, 0] = y
    s, q = _tile_stats(y[1:tl + 1], tl)                     # stats over the TL real rows only
    s_ref[0, 0] = s
    q_ref[0, 0] = q


def bn1_conv2_kernel(y1_ref, sc_ref, sh_ref, w_ref, y2_ref, s_ref, q_ref):
    # BN1 apply + ReLU fused with conv2 (+ BN2 partial stats).
    tl = y1_ref.shape[2] - 2
    y1 = y1_ref[0, 0]                                       # (TL+2, C) f32
    h = jnp.maximum(y1 * sc_ref[...] + sh_ref[...], 0.0)
    # conv2's zero padding: the halo row at the very start / end of each sequence must be 0 in h.
    t = pl.program_id(1)
    row = jax.lax.broadcasted_iota(jnp.int32, (tl + 2, 1), 0)
    edge = ((row == 0) & (t == 0)) | ((row == tl + 1) & (t == pl.num_programs(1) - 1))
    h = jnp.where(edge, 0.0, h)
    y2 = _conv3_bf16(h, w_ref[0], w_ref[1], w_ref[2], tl)
    y2_ref[0, 0] = y2
    s, q = _tile_stats(y2, tl)
    s_ref[0, 0] = s
    q_ref[0, 0] = q


def bn2_residual_kernel(y2_ref, x_ref, sc_ref, sh_ref, o_ref):
    y2 = y2_ref[0, 0]
    o_ref[0, 0] = jnp.maximum(y2 * sc_ref[...] + sh_ref[...] + x_ref[0, 0], 0.0)


# --------------------------------- Wrapper -------------------------------------
def _combine_stats(s, q, tl, n):
    """Combine per-tile (sum, centered ssq) -> global biased mean/var (Chan parallel variance)."""
    mean_t = s / tl                                        # (B, NT, 1, C)
    mean = jnp.sum(s, axis=(0, 1, 2)) / n                  # (C,)
    m2 = jnp.sum(q, axis=(0, 1, 2)) + tl * jnp.sum((mean_t - mean) ** 2, axis=(0, 1, 2))
    var = jnp.maximum(m2 / n, 0.0)
    return mean, var


def _scale_shift(gamma, beta, mean, var):
    scale = gamma * jax.lax.rsqrt(var + EPS)
    shift = beta - mean * scale
    return scale.reshape(1, -1), shift.reshape(1, -1)


def _vmem_limit(block_bytes):
    # ~double-buffered blocks + live compute copies + headroom, below v7x's 64 MiB physical VMEM.
    return int(min(60 << 20, max(16 << 20, 3 * block_bytes + (2 << 20))))


def resblock_pallas(x_ncl, w1, b1, g1, be1, w2, b2, g2, be2, *, tile_len=None):
    """x_ncl: (B, C, L) PyTorch layout; conv weights (Cout, Cin, 3) with Cin == Cout.

    Conv biases b1/b2 are accepted for API parity but unused: a per-channel constant added before
    training-mode BatchNorm is removed exactly by the mean subtraction.
    """
    del b1, b2
    x = jnp.transpose(x_ncl, (0, 2, 1)).astype(jnp.float32)       # (B, L, C) rows
    B, L, C = x.shape

    if tile_len is None:  # largest divisor of L up to 512 (real shapes want >=256-512 rows/tile)
        tile_len = max(d for d in range(1, min(L, 512) + 1) if L % d == 0)
    TL = tile_len
    assert L % TL == 0, "tile_len must divide L"
    NT = L // TL
    N = B * L
    f32 = jnp.float32

    # Weights -> (3, Cin, Cout) bf16, tap order [-1, 0, +1]; no channel padding.
    def prep_w(w):
        return jnp.transpose(w, (2, 1, 0)).astype(jnp.bfloat16)

    w1k, w2k = prep_w(w1), prep_w(w2)
    g1 = g1.astype(f32); be1 = be1.astype(f32)
    g2 = g2.astype(f32); be2 = be2.astype(f32)

    # Halo materialization in the wrapper: each length tile carries a 2-row halo.
    xpad = jnp.pad(x, ((0, 0), (2, 2), (0, 0)))                   # (B, L+4, C)
    idx = jnp.arange(NT)[:, None] * TL + jnp.arange(TL + 4)[None, :]
    xov = xpad[:, idx, :]                                         # (B, NT, TL+4, C)
    xres = x.reshape(B, NT, TL, C)

    grid = (B, NT)

    def act_spec(rows):
        return pl.BlockSpec((1, 1, rows, C), lambda b, t: (b, t, 0, 0))

    w_spec = pl.BlockSpec((3, C, C), lambda b, t: (0, 0, 0))
    vec_spec = pl.BlockSpec((1, C), lambda b, t: (0, 0))
    stat_spec = pl.BlockSpec((1, 1, 1, C), lambda b, t: (b, t, 0, 0))

    def cparams(block_bytes):
        return pltpu.CompilerParams(dimension_semantics=("parallel", "parallel"),
                                    vmem_limit_bytes=_vmem_limit(block_bytes))

    # ---- Pass A: conv1 + BN1 partial stats ------------------------------------
    bytes_a = (TL + 4) * C * 4 + 3 * C * C * 2 + (TL + 2) * C * 4 + 2 * C * 4
    y1ov, s1, q1 = pl.pallas_call(
        conv1_stats_kernel,
        grid=grid,
        in_specs=[act_spec(TL + 4), w_spec],
        out_specs=(act_spec(TL + 2), stat_spec, stat_spec),
        out_shape=(jax.ShapeDtypeStruct((B, NT, TL + 2, C), f32),
                   jax.ShapeDtypeStruct((B, NT, 1, C), f32),
                   jax.ShapeDtypeStruct((B, NT, 1, C), f32)),
        compiler_params=cparams(bytes_a),
    )(xov, w1k)

    mu1, var1 = _combine_stats(s1, q1, TL, N)
    sc1, sh1 = _scale_shift(g1, be1, mu1, var1)

    # ---- Pass B: BN1 apply + ReLU + conv2 + BN2 partial stats ------------------
    bytes_b = (TL + 2) * C * 4 + 2 * C * 4 + 3 * C * C * 2 + TL * C * 4 + 2 * C * 4
    y2, s2, q2 = pl.pallas_call(
        bn1_conv2_kernel,
        grid=grid,
        in_specs=[act_spec(TL + 2), vec_spec, vec_spec, w_spec],
        out_specs=(act_spec(TL), stat_spec, stat_spec),
        out_shape=(jax.ShapeDtypeStruct((B, NT, TL, C), f32),
                   jax.ShapeDtypeStruct((B, NT, 1, C), f32),
                   jax.ShapeDtypeStruct((B, NT, 1, C), f32)),
        compiler_params=cparams(bytes_b),
    )(y1ov, sc1, sh1, w2k)

    mu2, var2 = _combine_stats(s2, q2, TL, N)
    sc2, sh2 = _scale_shift(g2, be2, mu2, var2)

    # ---- Pass C: BN2 apply + residual + ReLU -----------------------------------
    bytes_c = 3 * TL * C * 4 + 2 * C * 4
    out = pl.pallas_call(
        bn2_residual_kernel,
        grid=grid,
        in_specs=[act_spec(TL), act_spec(TL), vec_spec, vec_spec],
        out_specs=act_spec(TL),
        out_shape=jax.ShapeDtypeStruct((B, NT, TL, C), f32),
        compiler_params=cparams(bytes_c),
    )(y2, xres, sc2, sh2)

    out = out.reshape(B, L, C)
    return jnp.transpose(out, (0, 2, 1))                          # back to (B, C, L)


# --------------------------- Pure-JAX reference --------------------------------
def resblock_ref(x_ncl, w1, b1, g1, be1, w2, b2, g2, be2):
    def conv1d(x, w, b):
        y = jax.lax.conv_general_dilated(
            x, w, window_strides=(1,), padding=[(1, 1)],
            dimension_numbers=('NCH', 'OIH', 'NCH'))
        return y + b[None, :, None]

    def bn(y, g, be):
        mu = y.mean(axis=(0, 2), keepdims=True)
        var = ((y - mu) ** 2).mean(axis=(0, 2), keepdims=True)
        return (y - mu) / jnp.sqrt(var + EPS) * g[None, :, None] + be[None, :, None]

    y = jax.nn.relu(bn(conv1d(x_ncl, w1, b1), g1, be1))
    y = bn(conv1d(y, w2, b2), g2, be2) + x_ncl
    return jax.nn.relu(y)


# ----------------------------------- Main ---------------------------------------
if __name__ == "__main__":
    B, C, L = 2, 8, 16          # in_channels == out_channels (required by the residual add)
    key = jax.random.PRNGKey(0)
    k = jax.random.split(key, 9)

    x = jax.random.normal(k[0], (B, C, L), dtype=jnp.float32)
    w1 = 0.2 * jax.random.normal(k[1], (C, C, 3), dtype=jnp.float32)
    b1 = 0.1 * jax.random.normal(k[2], (C,), dtype=jnp.float32)
    w2 = 0.2 * jax.random.normal(k[3], (C, C, 3), dtype=jnp.float32)
    b2 = 0.1 * jax.random.normal(k[4], (C,), dtype=jnp.float32)
    g1 = 1.0 + 0.1 * jax.random.normal(k[5], (C,), dtype=jnp.float32)   # exercise BN affine
    be1 = 0.1 * jax.random.normal(k[6], (C,), dtype=jnp.float32)
    g2 = 1.0 + 0.1 * jax.random.normal(k[7], (C,), dtype=jnp.float32)
    be2 = 0.1 * jax.random.normal(k[8], (C,), dtype=jnp.float32)

    out = resblock_pallas(x, w1, b1, g1, be1, w2, b2, g2, be2, tile_len=8)  # grid (2, 2)
    out = jax.block_until_ready(out)

    ref = resblock_ref(x, w1, b1, g1, be1, w2, b2, g2, be2)
    assert out.shape == (B, C, L)
    # Tolerance accounts for bf16 MXU operands (f32 accumulation).
    assert jnp.allclose(out, ref, rtol=3e-2, atol=3e-2), "mismatch vs pure-JAX reference"

    print("KERNEL_OK")
</pallas_src>

<mosaic_0001>
module attributes {stable_mosaic.version = 11 : i64} {
  func.func @conv1_stats_kernel(%arg0: i32, %arg1: i32, %arg2: memref<1x1x12x8xf32, #tpu.memory_space<vmem>>, %arg3: memref<3x8x8xbf16, #tpu.memory_space<vmem>>, %arg4: memref<1x1x10x8xf32, #tpu.memory_space<vmem>>, %arg5: memref<1x1x1x8xf32, #tpu.memory_space<vmem>>, %arg6: memref<1x1x1x8xf32, #tpu.memory_space<vmem>>) attributes {dimension_semantics = [#tpu.dimension_semantics<parallel>, #tpu.dimension_semantics<parallel>], iteration_bounds = array<i64: 2, 2>, scalar_prefetch = 0 : i64, scratch_operands = 0 : i64, tpu.core_type = #tpu.core_type<tc>, window_params = [{transform_indices = @transform_0, window_bounds = array<i64: 1, 1, 12, 8>}, {pipeline_mode = #tpu.pipeline_mode<synchronous>, transform_indices = @transform_1, window_bounds = array<i64: 3, 8, 8>}, {transform_indices = @transform_2, window_bounds = array<i64: 1, 1, 10, 8>}, {transform_indices = @transform_3, window_bounds = array<i64: 1, 1, 1, 8>}, {transform_indices = @transform_4, window_bounds = array<i64: 1, 1, 1, 8>}]} {
    %c0 = arith.constant 0 : index
    %c0_0 = arith.constant 0 : index
    %c0_1 = arith.constant 0 : index
    %c0_2 = arith.constant 0 : index
    %0 = vector.load %arg2[%c0, %c0_0, %c0_1, %c0_2] : memref<1x1x12x8xf32, #tpu.memory_space<vmem>>, vector<1x1x12x8xf32>
    %1 = vector.shape_cast %0 : vector<1x1x12x8xf32> to vector<12x8xf32>
    %c0_3 = arith.constant 0 : index
    %c0_4 = arith.constant 0 : index
    %c0_5 = arith.constant 0 : index
    %2 = vector.load %arg3[%c0_3, %c0_4, %c0_5] : memref<3x8x8xbf16, #tpu.memory_space<vmem>>, vector<1x8x8xbf16>
    %3 = vector.shape_cast %2 : vector<1x8x8xbf16> to vector<8x8xbf16>
    %c1 = arith.constant 1 : index
    %c0_6 = arith.constant 0 : index
    %c0_7 = arith.constant 0 : index
    %4 = vector.load %arg3[%c1, %c0_6, %c0_7] : memref<3x8x8xbf16, #tpu.memory_space<vmem>>, vector<1x8x8xbf16>
    %5 = vector.shape_cast %4 : vector<1x8x8xbf16> to vector<8x8xbf16>
    %c2 = arith.constant 2 : index
    %c0_8 = arith.constant 0 : index
    %c0_9 = arith.constant 0 : index
    %6 = vector.load %arg3[%c2, %c0_8, %c0_9] : memref<3x8x8xbf16, #tpu.memory_space<vmem>>, vector<1x8x8xbf16>
    %7 = vector.shape_cast %6 : vector<1x8x8xbf16> to vector<8x8xbf16>
    %8 = vector.extract_strided_slice %1 {offsets = [0, 0], sizes = [10, 8], strides = [1, 1]} : vector<12x8xf32> to vector<10x8xf32>
    %9 = arith.truncf %8 : vector<10x8xf32> to vector<10x8xbf16>
    %10 = vector.extract_strided_slice %1 {offsets = [1, 0], sizes = [10, 8], strides = [1, 1]} : vector<12x8xf32> to vector<10x8xf32>
    %11 = arith.truncf %10 : vector<10x8xf32> to vector<10x8xbf16>
    %12 = vector.extract_strided_slice %1 {offsets = [2, 0], sizes = [10, 8], strides = [1, 1]} : vector<12x8xf32> to vector<10x8xf32>
    %13 = arith.truncf %12 : vector<10x8xf32> to vector<10x8xbf16>
    %cst = arith.constant dense<0.000000e+00> : vector<10x8xf32>
    %14 = tpu.matmul %9, %3, %cst {dimension_numbers = #tpu.dot_dimension_numbers<[1], [0], [0], [1], [0, 0, 1, 1], [], []>} : vector<10x8xbf16>, vector<8x8xbf16>, vector<10x8xf32> -> vector<10x8xf32>
    %cst_10 = arith.constant dense<0.000000e+00> : vector<10x8xf32>
    %15 = tpu.matmul %11, %5, %cst_10 {dimension_numbers = #tpu.dot_dimension_numbers<[1], [0], [0], [1], [0, 0, 1, 1], [], []>} : vector<10x8xbf16>, vector<8x8xbf16>, vector<10x8xf32> -> vector<10x8xf32>
    %16 = arith.addf %14, %15 : vector<10x8xf32>
    %cst_11 = arith.constant dense<0.000000e+00> : vector<10x8xf32>
    %17 = tpu.matmul %13, %7, %cst_11 {dimension_numbers = #tpu.dot_dimension_numbers<[1], [0], [0], [1], [0, 0, 1, 1], [], []>} : vector<10x8xbf16>, vector<8x8xbf16>, vector<10x8xf32> -> vector<10x8xf32>
    %18 = arith.addf %16, %17 : vector<10x8xf32>
    %c0_12 = arith.constant 0 : index
    %c0_13 = arith.constant 0 : index
    %c0_14 = arith.constant 0 : index
    %c0_15 = arith.constant 0 : index
    %19 = vector.load %arg4[%c0_12, %c0_13, %c0_14, %c0_15] : memref<1x1x10x8xf32, #tpu.memory_space<vmem>>, vector<1x1x10x8xf32>
    %20 = vector.shape_cast %19 : vector<1x1x10x8xf32> to vector<10x8xf32>
    %21 = vector.shape_cast %18 : vector<10x8xf32> to vector<1x1x10x8xf32>
    tpu.vector_store %arg4[%c0_12, %c0_13, %c0_14, %c0_15], %21 {strides = array<i32>} : memref<1x1x10x8xf32, #tpu.memory_space<vmem>>, vector<1x1x10x8xf32>,
    %22 = vector.extract_strided_slice %18 {offsets = [1, 0], sizes = [8, 8], strides = [1, 1]} : vector<10x8xf32> to vector<8x8xf32>
    %cst_16 = arith.constant dense<0.000000e+00> : vector<8xf32>
    %23 = vector.multi_reduction <add>, %22, %cst_16 [0] : vector<8x8xf32> to vector<8xf32>
    %24 = vector.shape_cast %23 : vector<8xf32> to vector<1x8xf32>
    %cst_17 = arith.constant 1.250000e-01 : f32
    %25 = vector.broadcast %cst_17 : f32 to vector<1x8xf32>
    %26 = arith.mulf %24, %25 : vector<1x8xf32>
    %27 = vector.broadcast %26 : vector<1x8xf32> to vector<8x8xf32>
    %28 = arith.subf %22, %27 : vector<8x8xf32>
    %29 = arith.mulf %28, %28 : vector<8x8xf32>
    %cst_18 = arith.constant dense<0.000000e+00> : vector<8xf32>
    %30 = vector.multi_reduction <add>, %29, %cst_18 [0] : vector<8x8xf32> to vector<8xf32>
    %31 = vector.shape_cast %30 : vector<8xf32> to vector<1x8xf32>
    %c0_19 = arith.constant 0 : index
    %c0_20 = arith.constant 0 : index
    %c0_21 = arith.constant 0 : index
    %c0_22 = arith.constant 0 : index
    %32 = vector.load %arg5[%c0_19, %c0_20, %c0_21, %c0_22] : memref<1x1x1x8xf32, #tpu.memory_space<vmem>>, vector<1x1x1x8xf32>
    %33 = vector.shape_cast %32 : vector<1x1x1x8xf32> to vector<1x8xf32>
    %34 = vector.shape_cast %24 : vector<1x8xf32> to vector<1x1x1x8xf32>
    tpu.vector_store %arg5[%c0_19, %c0_20, %c0_21, %c0_22], %34 {strides = array<i32>} : memref<1x1x1x8xf32, #tpu.memory_space<vmem>>, vector<1x1x1x8xf32>,
    %c0_23 = arith.constant 0 : index
    %c0_24 = arith.constant 0 : index
    %c0_25 = arith.constant 0 : index
    %c0_26 = arith.constant 0 : index
    %35 = vector.load %arg6[%c0_23, %c0_24, %c0_25, %c0_26] : memref<1x1x1x8xf32, #tpu.memory_space<vmem>>, vector<1x1x1x8xf32>
    %36 = vector.shape_cast %35 : vector<1x1x1x8xf32> to vector<1x8xf32>
    %37 = vector.shape_cast %31 : vector<1x8xf32> to vector<1x1x1x8xf32>
    tpu.vector_store %arg6[%c0_23, %c0_24, %c0_25, %c0_26], %37 {strides = array<i32>} : memref<1x1x1x8xf32, #tpu.memory_space<vmem>>, vector<1x1x1x8xf32>,
    return
  }
  func.func @transform_0(%arg0: i32, %arg1: i32) -> (i32, i32, i32, i32) {
    %c0_i32 = arith.constant 0 : i32
    %c0_i32_0 = arith.constant 0 : i32
    %c0_i32_1 = arith.constant 0 : i32
    return %arg0, %arg1, %c0_i32, %c0_i32_0 : i32, i32, i32, i32
  }
  func.func @transform_1(%arg0: i32, %arg1: i32) -> (i32, i32, i32) {
    %c0_i32 = arith.constant 0 : i32
    %c0_i32_0 = arith.constant 0 : i32
    %c0_i32_1 = arith.constant 0 : i32
    %c0_i32_2 = arith.constant 0 : i32
    return %c0_i32, %c0_i32_0, %c0_i32_1 : i32, i32, i32
  }
  func.func @transform_2(%arg0: i32, %arg1: i32) -> (i32, i32, i32, i32) {
    %c0_i32 = arith.constant 0 : i32
    %c0_i32_0 = arith.constant 0 : i32
    %c0_i32_1 = arith.constant 0 : i32
    return %arg0, %arg1, %c0_i32, %c0_i32_0 : i32, i32, i32, i32
  }
  func.func @transform_3(%arg0: i32, %arg1: i32) -> (i32, i32, i32, i32) {
    %c0_i32 = arith.constant 0 : i32
    %c0_i32_0 = arith.constant 0 : i32
    %c0_i32_1 = arith.constant 0 : i32
    return %arg0, %arg1, %c0_i32, %c0_i32_0 : i32, i32, i32, i32
  }
  func.func @transform_4(%arg0: i32, %arg1: i32) -> (i32, i32, i32, i32) {
    %c0_i32 = arith.constant 0 : i32
    %c0_i32_0 = arith.constant 0 : i32
    %c0_i32_1 = arith.constant 0 : i32
    return %arg0, %arg1, %c0_i32, %c0_i32_0 : i32, i32, i32, i32
  }
}

</mosaic_0001>

<bundles_post_ra>
// kernel: tpu_custom_call.1
= control target key start
LH: loop header
LB: loop body
LE: loop exit
PB: predicated region body
PF: predicated region fallthrough
CT: control target
= control target key end

     0   :  { %10 = vsyncpa [#allocation3], 0  ;;  %s1117_s0 = inlined_call_operand.vmem [shape: f32[2,2,12,8], index: 0, kind: input, shape index: {}]   ;;  %s1118_s1 = inlined_call_operand.vmem [shape: bf16[3,8,8], index: 1, kind: input, shape index: {}]   ;;  %s1119_s2 = inlined_call_operand.vmem [shape: f32[2,2,10,8], index: 2, kind: output, shape index: {0}]   ;;  %s1120_s3 = inlined_call_operand.hbm [shape: f32[2,2,1,8], index: 3, kind: output, shape index: {1}]   ;;  %s1121_s4 = inlined_call_operand.hbm [shape: f32[2,2,1,8], index: 4, kind: output, shape index: {2}]  }
   0x1   :  { %12 = vsyncpa [#allocation3 + $0x1], 0 }
   0x2   :  { %13 = vsyncpa [#allocation5], 0 }
   0x3   :  { %15 = vsyncpa [#allocation5 + $0x1], 0  ;;  %s928_s15 = smov 0   ;;  %s930_s16 = smov 0  }
   0x4   :  { %s932_s17 = smov 0   ;;  %s934_s18 = smov 0  }
   0x5   :  { %s936_s19 = smov 0   ;;  %s938_s20 = smov 0  }
   0x6   :  { %s940_s21 = smov 0   ;;  %s942_s22 = smov 0  }
   0x7 LB: > { %s651_s23 = sadd.s32 4294967295, %s897_s22   ;;  %s652_s24 = sadd.s32 4294967294, %s897_s22   ;;  %s897_s22 = sphi %s942_s22, %s21_s22   ;;  %s893_s21 = sphi %s940_s21, %s1130_s21   ;;  %s889_s20 = sphi %s938_s20, %s1129_s20   ;;  %s885_s19 = sphi %s936_s19, %s1128_s19   ;;  %s881_s18 = sphi %s934_s18, %s1127_s18   ;;  %s877_s17 = sphi %s932_s17, %s1126_s17   ;;  %s873_s16 = sphi %s930_s16, %s1125_s16   ;;  %s869_s15 = sphi %s928_s15, %s1124_s15  }
   0x8   : > { %s30_s25 = sadd.s32 1, %s889_s20  ;;  %s33_s26 = sadd.s32 1, %s893_s21 }
   0x9   : > { %p31_p0 = scmp.ge.s32.totalorder %s30_s25, 2  ;;  %p129_p1 = scmp.ne.s32.totalorder %s877_s17, %s873_s16 }
   0xa   : > { %p130_p2 = scmp.eq.s32.totalorder %s651_s23, 3  ;;  %p135_p5 = scmp.ne.s32.totalorder %s873_s16, %s869_s15 }
   0xb   : > { %s1132_s25 = smov (%p31_p0, %s30_s25), 0  ;;  %s1134_s26 = smov (!%p31_p0, %s33_s26), %s893_s21 }
   0xc   : > { %s115_s27 = ssub.s32 %s889_s20, %s1132_s25  ;;  %p979_p3 = por %p130_p2, %p129_p1 }
   0xd   : > { %p35_p4 = scmp.ge.s32.totalorder %s1134_s26, 2  ;;  %p136_p6 = scmp.eq.s32.totalorder %s652_s24, 3 }
   0xe   : > { %p655_p7 = scmp.ge.s32.totalorder %s897_s22, 1  ;;  %p197_p9 = scmp.lt.s32.totalorder %s897_s22, 5 }
   0xf   : > { %s1136_s26 = smov (%p35_p4, %s1134_s26), 0  ;;  %p988_p8 = por %p136_p6, %p135_p5 }
  0x10   : > { %s114_s30 = ssub.s32 %s893_s21, %s1136_s26  ;;  %s119_s5 = sadd.s32 1, %s877_s17 }
  0x11   : > { %s116_s6 = sor.u32 %s115_s27, %s114_s30  ;;  %p198_p10 = pnand %p655_p7, %p197_p9 }
  0x12   : > { %p117_p11 = scmp.eq.s32.totalorder %s116_s6, 0  ;;  %p239_p12 = scmp.lt.s32.totalorder (!%p198_p10), %s885_s19, 1 }
  0x13   : > { %201 = sbr.rel (%p198_p10) target bundleno = 309 (0x135), region = 28  ;;  %p241_p13 = scmp.lt.s32.totalorder (!%p198_p10), %s881_s18, 1 }
  0x14   : > { %s997_s7 = scalar_select %p117_p11, %s877_s17, %s119_s5  }
  0x15   : > { %s901_s9 = smov (!%p198_p10), [#allocation2]  }
  0x16   : > { %s779_s10 = sshll.u32 (!%p198_p10), %s901_s9, 4  ;;  %s780_s10 = int_to_ptr.vmem [resolvable:$false] %s779_s10 }
  0x17   : > { %s781_s11 = scalar_lea.vmem (!%p198_p10), %s780_s10, 32 }
  0x18   : > { %v662_v0 = vld [vmem:[%s1118_s1 + $0x4] sm:$0xf]  ;;  %vm277_vm0 = vcmask 1043456   ;;  %v260_v1 = vld [vmem:[%s1118_s1] sm:$0xf]  ;;  %v899_v2 = vmov 0.0  }
  0x19   : > { %679 = vmatprep.subr.bf16.mxu0 %v899_v2  ;;  %v279_v3 = vsel %vm277_vm0, %v662_v0, 0  ;;  %685 = vmatprep.subr.bf16.mxu1 %v899_v2  ;;  %v325_v4 = vsel %vm277_vm0, %v260_v1, 0  ;;  %vm900_vm1 = vmmov 0   ;;  %s240_s12 = scalar_select %p239_p12, %s885_s19, 1  ;;  %vm273_vm2 = vcmask 64512  }
  0x1a   : > { %680 = vmatpush3.bf16.msra.mxu0 %v279_v3  ;;  %686 = vmatpush3.bf16.msra.mxu1 %v325_v4  ;;  %s242_s13 = scalar_select %p241_p13, %s881_s18, 1  ;;  %v663_v10 = vld [vmem:[%s1118_s1 + $0x8] sm:$0xf]  ;;  %vm420_vm3 = vcmask 58368   ;;  %vm424_vm4 = vcmask 1046528   ;;  %vm454_vm5 = vcmask 57344  }
  0x1b   : > { %681 = vmatprep.mubr.msk.bf16.mxu0 %vm900_vm1, %v899_v2  ;;  %687 = vmatprep.mubr.msk.bf16.mxu1 %vm900_vm1, %v899_v2  ;;  %s657_s14 = sshll.u32 %s240_s12, 2  ;;  %v374_v13 = vsel %vm277_vm0, %v663_v10, 0 }
  0x1c   : > { %691 = vmatprep.subr.bf16.mxu0 %v899_v2  ;;  %s656_s23 = sshll.u32 %s242_s13, 1  ;;  %s667_s13 = sshll.u32 %s885_s19, 1 }
  0x1d   : > { %s1013_s24 = sadd.s32 %s657_s14, %s656_s23  ;;  %s1035_s14 = sand.u32 1, %s873_s16  }
  0x1e   : > { %s658_s27 = sshll.u32 %s1013_s24, 3  ;;  %s1038_s23 = sadd.s32 %s881_s18, %s667_s13 }
  0x1f   : > { %s247_s6 = scalar_lea.vmem %s1117_s0, %s658_s27  ;;  %s256_s12 = scalar_lea.vmem %s1119_s2, %s658_s27 }
  0x20   : > { %v258_v5 = vld [vmem:[%s247_s6] sm:$0xff]  ;;  %v259_v6 = vld [vmem:[%s247_s6 + $0x8] sm:$0xf]  ;;  %s668_s24 = sshll.u32 %s1038_s23, 4  ;;  %s232_s27 = scalar_lea.vmem [#allocation2], %s1035_s14 }
  0x21   : > { %v265_v7 = vpack.c.bf16 %v259_v6, %v258_v5  ;;  %s488_s30 = sshll.u32 %s232_s27, 4  ;;  %s1047_s6 = scalar_lea.hbm %s1120_s3, %s668_s24  ;;  %s489_s30 = int_to_ptr.vmem [resolvable:$true] %s488_s30 }
  0x22   : > { %s467_s18 = scalar_lea.sflag [#allocation3], %s1035_s14  ;;  %s775_s8 = scalar_lea.vmem %s489_s30, 16 }
  0x23   : > { %v267_v8 = vshrl.u32 %v265_v7, 16  ;;  %v269_v9 = vshll.u32 %v265_v7, 16  ;;  %688 = vmatmul.mubr.msk.bf16.vlgmr.msra.gmra.mxu1 %vm273_vm2, %v265_v7  ;;  %v369_v14 = vrot.slane %v265_v7, 1  ;;  %p776_p0 = scmp.ne.s32.totalorder %s489_s30, %s775_s8  ;;  %p782_p4 = scmp.lt.s32.totalorder %s489_s30, %s780_s10 }
  0x24   : > { %p783_p5 = scmp.lt.s32.totalorder %s781_s11, %s775_s8 }
  0x25   : > { %v271_v11 = vrot.slane %v269_v9, 1  ;;  %p777_p1 = pnand %p776_p0, %p979_p3 }
  0x26   : > { %p784_p6 = por %p783_p5, %p782_p4 }
  0x27   : > { %v272_v12 = vor.u32 %v271_v11, %v267_v8  ;;  %p778_p2 = pneg %p777_p1 }
  0x29   : > { %682 = vmatmul.mubr.msk.bf16.vlgmr.msra.gmra.mxu0 %vm273_vm2, %v272_v12  ;;  %p785_p7 = pnand %p784_p6, %p778_p2 }
  0x2a   : > { %692 = vmatpush3.bf16.msra.mxu0 %v374_v13  ;;  %693 = vmatprep.mubr.msk.bf16.mxu0 %vm900_vm1, %v899_v2 }
  0x31   : > { %694 = vmatmul.mubr.msk.bf16.vlgmr.msra.gmra.mxu0 %vm273_vm2, %v369_v14 }
  0xe3   : > { %v361_v15 = vpop.f32.mrf.mxu1 }
  0xe5   : > { %v689_v16 = vpop.f32.mrf.mxu1 }
  0xe7   : > { %v364_v17 = vpop.f32.mrf.mxu1 }
  0xe9   : > { %v315_v18 = vpop.f32.mrf.mxu0  ;;  %v690_v19 = vpop.f32.mrf.mxu1 }
  0xea   : > { %v362_v23 = vadd.f32 %v361_v15, %v315_v18 }
  0xeb   : > { %v683_v20 = vpop.f32.mrf.mxu0 }
  0xed   : > { %v318_v21 = vpop.f32.mrf.mxu0 }
  0xee   : > { %v365_v27 = vadd.f32 %v364_v17, %v318_v21 }
  0xef   : > { %v684_v22 = vpop.f32.mrf.mxu0 }
  0xf1   : > { %v410_v24 = vpop.f32.mrf.mxu0 }
  0xf2   : > { %v417_v25 = vadd.f32 %v410_v24, %v362_v23 }
  0xf3   : > { %v695_v26 = vpop.f32.mrf.mxu0 }
  0xf4   : > { %419 = vst.msk [vmem:[%s256_s12] sm:$0xff] %vm273_vm2, %v417_v25  ;;  %v425_v31 = vrot.slane %v417_v25, 1 }
  0xf5   : > { %v413_v28 = vpop.f32.mrf.mxu0 }
  0xf6   : > { %v418_v29 = vadd.f32 %v413_v28, %v365_v27 }
  0xf7   : > { %v696_v30 = vpop.f32.mrf.mxu0 }
  0xf8   : > { %421 = vst.msk [vmem:[%s256_s12 + $0x8] sm:$0x3] %vm420_vm3, %v418_v29  ;;  %v426_v32 = vrot.slane %v418_v29, 1 }
  0xfa   : > { %v427_v33 = vsel %vm424_vm4, %v425_v31, %v426_v32 }
  0xfb   : > { %v429_v34 = vsel %vm273_vm2, %v427_v33, 0.0 }
  0xfc   : > { %v430_v35 = vrot.slane %v429_v34, 4 }
  0xfe   : > { %v431_v36 = vadd.f32 %v430_v35, %v429_v34 }
 0x100   : > { %v432_v37 = vrot.slane %v431_v36, 2 }
 0x102   : > { %v433_v38 = vadd.f32 %v432_v37, %v431_v36 }
 0x104   : > { %v434_v39 = vrot.slane %v433_v38, 1 }
 0x106   : > { %v435_v40 = vadd.f32 %v434_v39, %v433_v38 }
 0x108   : > { %v436_v41 = vmul.f32 0.125, %v435_v40  ;;  %455 = vst.msk [vmem:[%s232_s27] sm:$0x1] %vm454_vm5, %v435_v40 }
 0x109   : > { %788 = shalt.err (!%p785_p7)
}
 0x10a   : > { %s789_s12 = scalar_lea.hbm %s1047_s6, 16  ;;  %s793_s19 = scalar_lea.hbm %s1120_s3, 64 }
 0x10b   : > { %p790_p9 = scmp.ne.s32.totalorder %s1047_s6, %s789_s12  ;;  %p794_p12 = scmp.lt.s32.totalorder %s1047_s6, %s1120_s3 }
 0x10c   : > { %p795_p13 = scmp.lt.s32.totalorder %s793_s19, %s789_s12 }
 0x10d   : > { %p791_p10 = pnand %p790_p9, %p979_p3 }
 0x10e   : > { %p796_p0 = por %p795_p13, %p794_p12 }
 0x10f   : > { %p792_p11 = pneg %p791_p10 }
 0x111   : > { %p797_p1 = pnand %p796_p0, %p792_p11 }
 0x113   : > { %800 = shalt.err (!%p797_p1)
}
 0x114   : > { %697 = dma.vmem_to_hbm [thread:$0]  (%p979_p3), %s489_s30, 16, %s1047_s6, %s467_s18   ;;  %v437_v42 = vsub.f32 %v417_v25, %v436_v41  ;;  %v438_v43 = vsub.f32 %v418_v29, %v436_v41 }
 0x115   : > { %s238_s8 = scalar_lea.vmem [#allocation4], %s1035_s14  ;;  %s501_s18 = scalar_lea.hbm %s1121_s4, %s668_s24 }
 0x116   : > { %v439_v44 = vmul.f32 %v437_v42, %v437_v42  ;;  %v440_v45 = vmul.f32 %v438_v43, %v438_v43  ;;  %s503_s10 = sshll.u32 %s238_s8, 4  ;;  %s471_s11 = scalar_lea.sflag [#allocation5], %s1035_s14  ;;  %s504_s10 = int_to_ptr.vmem [resolvable:$true] %s503_s10 }
 0x117   : > { %s801_s12 = scalar_lea.vmem %s504_s10, 16  ;;  %s902_s13 = smov [#allocation4]  }
 0x118   : > { %v443_v46 = vrot.slane %v439_v44, 1  ;;  %v444_v47 = vrot.slane %v440_v45, 1  ;;  %p802_p2 = scmp.ne.s32.totalorder %s504_s10, %s801_s12  ;;  %s805_s27 = sshll.u32 %s902_s13, 4  ;;  %s806_s27 = int_to_ptr.vmem [resolvable:$false] %s805_s27 }
 0x119   : > { %s807_s19 = scalar_lea.vmem %s806_s27, 32  ;;  %p808_p6 = scmp.lt.s32.totalorder %s504_s10, %s806_s27 }
 0x11a   : > { %v445_v48 = vsel %vm424_vm4, %v443_v46, %v444_v47  ;;  %p803_p4 = pnand %p802_p2, %p979_p3  ;;  %p809_p7 = scmp.lt.s32.totalorder %s807_s19, %s801_s12 }
 0x11b   : > { %v447_v49 = vsel %vm273_vm2, %v445_v48, 0.0 }
 0x11c   : > { %v448_v50 = vrot.slane %v447_v49, 4  ;;  %p804_p5 = pneg %p803_p4  ;;  %p810_p9 = por %p809_p7, %p808_p6 }
 0x11e   : > { %v449_v51 = vadd.f32 %v448_v50, %v447_v49  ;;  %p811_p10 = pnand %p810_p9, %p804_p5 }
 0x120   : > { %v450_v52 = vrot.slane %v449_v51, 2 }
 0x122   : > { %v451_v53 = vadd.f32 %v450_v52, %v449_v51 }
 0x124   : > { %v452_v54 = vrot.slane %v451_v53, 1 }
 0x126   : > { %v453_v55 = vadd.f32 %v452_v54, %v451_v53 }
 0x128   : > { %456 = vst.msk [vmem:[%s238_s8] sm:$0x1] %vm454_vm5, %v453_v55 }
 0x129   : > { %814 = shalt.err (!%p811_p10)
}
 0x12a   : > { %s815_s23 = scalar_lea.hbm %s501_s18, 16  ;;  %s819_s5 = scalar_lea.hbm %s1121_s4, 64 }
 0x12b   : > { %p816_p11 = scmp.ne.s32.totalorder %s501_s18, %s815_s23  ;;  %p820_p0 = scmp.lt.s32.totalorder %s501_s18, %s1121_s4 }
 0x12c   : > { %p821_p1 = scmp.lt.s32.totalorder %s819_s5, %s815_s23 }
 0x12d   : > { %p817_p12 = pnand %p816_p11, %p979_p3 }
 0x12e   : > { %p822_p2 = por %p821_p1, %p820_p0 }
 0x12f   : > { %p818_p13 = pneg %p817_p12 }
 0x131   : > { %p823_p4 = pnand %p822_p2, %p818_p13 }
 0x133   : > { %826 = shalt.err (!%p823_p4)
}
 0x134   : > { %698 = dma.vmem_to_hbm [thread:$0]  (%p979_p3), %s504_s10, 16, %s501_s18, %s471_s11  }
 0x135 PF: > { %p708_p5 = scmp.ge.s32.totalorder %s897_s22, 2  ;;  %s527_s30 = sand.u32 1, %s869_s15  }
 0x136   : > { %s528_s6 = scalar_lea.sflag [#allocation3], %s527_s30 }
 0x137   : > { %p702_p6 = pnand %p708_p5, %p988_p8 }
 0x139   : > { %p703_p7 = pneg %p702_p6 }
 0x13b   : > { %860 = dma.done.wait (%p703_p7), %s528_s6, 16  }
 0x13c   : > { %862 = vsyncadd (%p703_p7), %s528_s6, 4294967280  ;;  %s536_s12 = scalar_lea.sflag [#allocation5], %s527_s30 }
 0x13d   : > { %864 = dma.done.wait (%p703_p7), %s536_s12, 16  }
 0x13e   : > { %866 = vsyncadd (%p703_p7), %s536_s12, 4294967280  ;;  %s21_s22 = sadd.s32 1, %s897_s22   ;;  %s1124_s15 = smov %s873_s16 }
 0x13f   : > { %p18_p9 = scmp.ge.s32.totalorder %s21_s22, 6   ;;  %s1125_s16 = smov %s877_s17 }
 0x140   : > { %s1126_s17 = smov %s997_s7  ;;  %s1127_s18 = smov %s889_s20 }
 0x141   : > { %s1128_s19 = smov %s893_s21  ;;  %s1129_s20 = smov %s1132_s25 }
 0x142   : > { %s1130_s21 = smov %s1136_s26  ;;  %20 = sbr.rel (!%p18_p9) target bundleno = 7 (0x7), region = 94 }
 0x147   :  { %540 = vsyncpa [#allocation3], 1 }
 0x148   :  { %542 = vsyncpa [#allocation3 + $0x1], 1 }
 0x149   :  { %543 = vsyncpa [#allocation5], 1 }
 0x14a   :  { %545 = vsyncpa [#allocation5 + $0x1], 1 }

</bundles_post_ra>
